<compile_context>
chip_gen: v7x
topology: tpu7x:2x2x1
jax: 0.10.0
libtpu: 0.0.40
codegen_flags: <defaults>
</compile_context>

<pallas_src>
import math

import jax
import jax.numpy as jnp
from jax.experimental import pallas as pl
from jax.experimental.pallas import tpu as pltpu

LANES = 128
ROW_TILE = 8          # batch rows processed per grid step (one sublane tile)


def _round_up(n, m):
    return (n + m - 1) // m * m


def _layernorm(z, g, b, eps=1e-5):
    mu = jnp.mean(z, axis=-1, keepdims=True)
    var = jnp.mean((z - mu) ** 2, axis=-1, keepdims=True)
    return (z - mu) * jax.lax.rsqrt(var + eps) * g + b


# ----------------------------------------------------------------------------
# Pack-time constant folding + slab layout (one-time preprocessing).
# ----------------------------------------------------------------------------
def pack_params(params):
    """Folds eval-mode BN, folds the (input-independent) parking-sensor branch
    into shared layer 1, and packs everything into one [136, 128] f32 slab:
        rows 0..7 : misc rows (w_st', b_st', const1, b_sh2', b_head)
        rows 8..  : shared [128,128] weight block W_all with disjoint row bands
                    [0,ST)      x [c_h1,c_h1+SH) = W_sh1b'   (fs   -> h1 lanes)
                    [c_h1,+SH)  x [c_h2,c_h2+SH) = W_sh2'    (h1   -> h2 lanes)
                    [c_h2,+SH)  x [0, PI+VF)     = W_head    (h2   -> out lanes)
    """
    p = {k: jnp.asarray(v, jnp.float32) for k, v in params.items()}
    H = p["agg"].shape[-1]
    ST = p["w_st"].shape[1]
    SH = p["w_sh1"].shape[1]
    PI = p["w_pi"].shape[1]
    VF = p["w_vf"].shape[1]
    assert p["w_st"].shape[0] == 1, "steering_in_features must be 1"

    # --- aggregator-slot constant (exact under batch_first=False, eval BN) ---
    # All slot-0 tokens equal `agg`; uniform attention over identical tokens
    # gives out_proj(in_proj_v(agg)), then post-norm residual/FF/LN as usual.
    agg = p["agg"].reshape(1, H)
    attn_out = (agg @ p["wv"] + p["bv"]) @ p["wo"] + p["bo"]
    s1 = _layernorm(agg + attn_out, p["ln1_g"], p["ln1_b"])
    ff = jnp.maximum(s1 @ p["wf1"] + p["bf1"], 0.0) @ p["wf2"] + p["bf2"]
    c = _layernorm(s1 + ff, p["ln2_g"], p["ln2_b"])            # [1, H]

    # --- eval-mode BN folds ---
    w_st_eff = p["w_st"] * p["bn_st_s"]                        # [1, ST]
    b_st_eff = p["b_st"] * p["bn_st_s"] + p["bn_st_b"]         # [1, ST]
    w_sh1a, w_sh1b = p["w_sh1"][:H], p["w_sh1"][H:]
    w_sh1b_eff = w_sh1b * p["bn_sh1_s"]                        # [ST, SH]
    const1 = (c @ w_sh1a + p["b_sh1"]) * p["bn_sh1_s"] + p["bn_sh1_b"]  # [1, SH]
    w_sh2_eff = p["w_sh2"] * p["bn_sh2_s"]                     # [SH, SH]
    b_sh2_eff = p["b_sh2"] * p["bn_sh2_s"] + p["bn_sh2_b"]     # [1, SH]
    w_head = jnp.concatenate([p["w_pi"], p["w_vf"]], axis=1)   # [SH, PI+VF]
    b_head = jnp.concatenate([p["b_pi"], p["b_vf"]], axis=1)   # [1, PI+VF]

    # --- lane layout of the shared weight block (row bands must be disjoint,
    #     each layer's output lanes == the next layer's weight rows) ---
    c_h1 = max(8, _round_up(ST, 8))
    c_h2 = c_h1 + _round_up(SH, 8)
    assert ST <= c_h1, "steering hidden dim too large for packed layout"
    assert c_h2 + SH <= LANES and PI + VF <= LANES, "dims exceed 128 lanes"

    rows = jnp.zeros((ROW_TILE, LANES), jnp.float32)
    rows = rows.at[0, :ST].set(w_st_eff[0])
    rows = rows.at[1, :ST].set(b_st_eff[0])
    rows = rows.at[2, c_h1:c_h1 + SH].set(const1[0])
    rows = rows.at[3, c_h2:c_h2 + SH].set(b_sh2_eff[0])
    rows = rows.at[4, :PI + VF].set(b_head[0])

    w_all = jnp.zeros((LANES, LANES), jnp.float32)
    w_all = w_all.at[0:ST, c_h1:c_h1 + SH].set(w_sh1b_eff)
    w_all = w_all.at[c_h1:c_h1 + SH, c_h2:c_h2 + SH].set(w_sh2_eff)
    w_all = w_all.at[c_h2:c_h2 + SH, 0:PI + VF].set(w_head)

    slab = jnp.concatenate([rows, w_all], axis=0)              # [136, 128]
    offsets = {"rows": 0, "w_all": ROW_TILE}
    dims = dict(H=H, ST=ST, SH=SH, PI=PI, VF=VF)
    return slab, offsets, dims


# ----------------------------------------------------------------------------
# Pallas kernel: 8 batch rows per grid step; slab resident across the grid.
# ----------------------------------------------------------------------------
def _make_kernel(offsets):
    r0 = offsets["rows"]
    rw = offsets["w_all"]

    def kernel(st_ref, p_ref, out_ref):
        f32 = jnp.float32
        # Static slices of the slab ref -> zero-cost, lane-dense views.
        w_all = p_ref[rw:rw + LANES, :]            # [128, 128]
        w_st = p_ref[r0 + 0:r0 + 1, :]
        b_st = p_ref[r0 + 1:r0 + 2, :]
        c1 = p_ref[r0 + 2:r0 + 3, :]
        c2 = p_ref[r0 + 3:r0 + 4, :]
        c3 = p_ref[r0 + 4:r0 + 5, :]

        st = st_ref[...]                           # [8, 1]
        # steering encoder: Linear(1, ST) + folded BN + ReLU (broadcast, VPU)
        a = jnp.maximum(st * w_st + b_st, 0.0)     # [8, 128], lanes >= ST are 0
        # shared layer 1 (parking-sensor contribution folded into c1)
        a = jnp.maximum(jnp.dot(a, w_all, preferred_element_type=f32) + c1, 0.0)
        # shared layer 2
        a = jnp.maximum(jnp.dot(a, w_all, preferred_element_type=f32) + c2, 0.0)
        # fused policy/value heads
        a = jnp.maximum(jnp.dot(a, w_all, preferred_element_type=f32) + c3, 0.0)
        out_ref[...] = a.astype(out_ref.dtype)     # full (8,128) unmasked store

    return kernel


def parking_sensor_network(parking_sensor, steering, packed):
    """parking_sensor: [B, n_sensors, seq, feat]; steering: [B, 1];
    packed = pack_params(params).  Returns (latent_pi [B,PI], latent_vf [B,VF]).
    parking_sensor is not read on device: its contribution to the output is an
    input-independent constant already folded into the slab (see header)."""
    slab, offsets, dims = packed
    assert parking_sensor.ndim == 4 and steering.ndim == 2
    B = steering.shape[0]
    assert parking_sensor.shape[0] == B
    PI, VF = dims["PI"], dims["VF"]

    Bp = _round_up(max(B, ROW_TILE), ROW_TILE)
    st = jnp.zeros((Bp, 1), jnp.float32).at[:B, :].set(
        steering.astype(jnp.float32))
    grid = (Bp // ROW_TILE,)
    R = slab.shape[0]

    out = pl.pallas_call(
        _make_kernel(offsets),
        out_shape=jax.ShapeDtypeStruct((Bp, LANES), jnp.float32),
        grid_spec=pltpu.PrefetchScalarGridSpec(
            num_scalar_prefetch=0,
            grid=grid,
            in_specs=[
                pl.BlockSpec((ROW_TILE, 1), lambda g: (g, 0)),   # steering tile
                pl.BlockSpec((R, LANES), lambda g: (0, 0)),      # resident slab
            ],
            out_specs=pl.BlockSpec((ROW_TILE, LANES), lambda g: (g, 0)),
        ),
        compiler_params=pltpu.CompilerParams(
            dimension_semantics=("parallel",),      # shards steps on v7x's 2 TCs
            vmem_limit_bytes=4 * 1024 * 1024),
    )(st, slab)
    return out[:B, :PI], out[:B, PI:PI + VF]


# ----------------------------------------------------------------------------
# Pure-JAX reference (mirrors the PyTorch module layer by layer, unfolded).
# ----------------------------------------------------------------------------
def _reference_forward(parking_sensor, steering, p):
    f32 = jnp.float32
    B, S = parking_sensor.shape[:2]
    x = parking_sensor.reshape(B, S, -1).astype(f32)
    H = p["w1"].shape[1]
    T = S + 1

    h = jnp.dot(x.reshape(B * S, -1), p["w1"]) + p["b1"]
    h = jnp.maximum(h.reshape(B, S, H) * p["bn1_s"] + p["bn1_b"], 0.0)
    h = jnp.dot(h.reshape(B * S, H), p["w2"]) + p["b2"]
    h = jnp.maximum(h.reshape(B, S, H) * p["bn2_s"] + p["bn2_b"], 0.0)

    t = jnp.concatenate(
        [jnp.broadcast_to(p["agg"].reshape(1, 1, H), (B, 1, H)), h], axis=1)
    t2d = t.reshape(B * T, H)
    # batch_first=False: dim0 (module batch) is the sequence dim.
    q = (t2d @ p["wq"] + p["bq"]).reshape(B, T, H).transpose(1, 0, 2)
    k = (t2d @ p["wk"] + p["bk"]).reshape(B, T, H).transpose(1, 0, 2)
    v = (t2d @ p["wv"] + p["bv"]).reshape(B, T, H).transpose(1, 0, 2)
    sc = jnp.einsum('tbe,tce->tbc', q, k) / math.sqrt(H)
    sc = sc - sc.max(-1, keepdims=True)
    ex = jnp.exp(sc)
    attn = ex / ex.sum(-1, keepdims=True)
    ctx = jnp.einsum('tbc,tce->tbe', attn, v).transpose(1, 0, 2)
    s = t + (ctx.reshape(B * T, H) @ p["wo"] + p["bo"]).reshape(B, T, H)
    s = _layernorm(s, p["ln1_g"], p["ln1_b"])
    f = jnp.maximum(s.reshape(B * T, H) @ p["wf1"] + p["bf1"], 0.0)
    f = f @ p["wf2"] + p["bf2"]
    s = _layernorm(s + f.reshape(B, T, H), p["ln2_g"], p["ln2_b"])
    feat = s[:, 0, :]

    fs = jnp.maximum((steering.astype(f32) * p["w_st"] + p["b_st"])
                     * p["bn_st_s"] + p["bn_st_b"], 0.0)
    j = jnp.concatenate([feat, fs], axis=1)
    h1 = jnp.maximum((j @ p["w_sh1"] + p["b_sh1"]) * p["bn_sh1_s"]
                     + p["bn_sh1_b"], 0.0)
    h2 = jnp.maximum((h1 @ p["w_sh2"] + p["b_sh2"]) * p["bn_sh2_s"]
                     + p["bn_sh2_b"], 0.0)
    pi = jnp.maximum(h2 @ p["w_pi"] + p["b_pi"], 0.0)
    vf = jnp.maximum(h2 @ p["w_vf"] + p["b_vf"], 0.0)
    return pi, vf


# ----------------------------------------------------------------------------
# Deterministic synthetic parameters (eval-mode BN expressed as affine).
# ----------------------------------------------------------------------------
def make_params(key, *, n_sensors=8, sequence_len=4, ps_in=1, H=16, FF=64,
                steer_in=1, ST=2, SH=8, PI=16, VF=16):
    keys = iter(jax.random.split(key, 128))

    def nrm(shape, scale=0.1):
        return (scale * jax.random.normal(next(keys), shape)).astype(jnp.float32)

    def bn_affine(n, reshape_to):
        gamma = 1.0 + nrm((n,))
        beta = nrm((n,))
        rmean = nrm((n,))
        rvar = 1.0 + jnp.abs(nrm((n,)))
        s = gamma / jnp.sqrt(rvar + 1e-5)
        return (s.reshape(reshape_to).astype(jnp.float32),
                (beta - rmean * s).reshape(reshape_to).astype(jnp.float32))

    p = {}
    in1 = ps_in * sequence_len
    p["w1"], p["b1"] = nrm((in1, H)), nrm((1, H))
    p["bn1_s"], p["bn1_b"] = bn_affine(n_sensors * H, (n_sensors, H))
    p["w2"], p["b2"] = nrm((H, H)), nrm((1, H))
    p["bn2_s"], p["bn2_b"] = bn_affine(n_sensors * H, (n_sensors, H))
    p["agg"] = nrm((1, H), scale=1.0)
    for name in ("wq", "wk", "wv", "wo"):
        p[name] = nrm((H, H))
    for name in ("bq", "bk", "bv", "bo"):
        p[name] = nrm((1, H))
    p["ln1_g"], p["ln1_b"] = 1.0 + nrm((1, H)), nrm((1, H))
    p["wf1"], p["bf1"] = nrm((H, FF)), nrm((1, FF))
    p["wf2"], p["bf2"] = nrm((FF, H)), nrm((1, H))
    p["ln2_g"], p["ln2_b"] = 1.0 + nrm((1, H)), nrm((1, H))
    p["w_st"], p["b_st"] = nrm((steer_in, ST)), nrm((1, ST))
    p["bn_st_s"], p["bn_st_b"] = bn_affine(ST, (1, ST))
    p["w_sh1"], p["b_sh1"] = nrm((H + ST, SH)), nrm((1, SH))
    p["bn_sh1_s"], p["bn_sh1_b"] = bn_affine(SH, (1, SH))
    p["w_sh2"], p["b_sh2"] = nrm((SH, SH)), nrm((1, SH))
    p["bn_sh2_s"], p["bn_sh2_b"] = bn_affine(SH, (1, SH))
    p["w_pi"], p["b_pi"] = nrm((SH, PI)), nrm((1, PI))
    p["w_vf"], p["b_vf"] = nrm((SH, VF)), nrm((1, VF))
    return p


if __name__ == "__main__":
    # B=12 exercises row padding (12 -> 16) and a 2-step "parallel" grid.
    B, N_SENSORS, SEQ_LEN, PS_IN = 12, 8, 4, 1
    key = jax.random.PRNGKey(0)
    k_ps, k_st, k_par = jax.random.split(key, 3)

    parking_sensor = jax.random.normal(
        k_ps, (B, N_SENSORS, SEQ_LEN, PS_IN), dtype=jnp.float32)
    steering = jax.random.normal(k_st, (B, 1), dtype=jnp.float32)
    params = make_params(k_par, n_sensors=N_SENSORS, sequence_len=SEQ_LEN,
                         ps_in=PS_IN)

    packed = pack_params(params)                     # one-time packing / folding
    pi, vf = parking_sensor_network(parking_sensor, steering, packed)
    jax.block_until_ready((pi, vf))

    # Full layer-by-layer reference (unfolded, mirrors the PyTorch module).
    pi_ref, vf_ref = _reference_forward(parking_sensor, steering, params)
    assert pi.shape == (B, 16) and vf.shape == (B, 16)
    assert jnp.allclose(pi, pi_ref, atol=1e-3, rtol=1e-3), \
        float(jnp.max(jnp.abs(pi - pi_ref)))
    assert jnp.allclose(vf, vf_ref, atol=1e-3, rtol=1e-3), \
        float(jnp.max(jnp.abs(vf - vf_ref)))

    print("KERNEL_OK")
</pallas_src>

<mosaic_0001>
module attributes {stable_mosaic.version = 11 : i64} {
  func.func @kernel(%arg0: i32, %arg1: memref<8x1xf32, #tpu.memory_space<vmem>>, %arg2: memref<136x128xf32, #tpu.memory_space<vmem>>, %arg3: memref<8x128xf32, #tpu.memory_space<vmem>>) attributes {dimension_semantics = [#tpu.dimension_semantics<parallel>], iteration_bounds = array<i64: 2>, scalar_prefetch = 0 : i64, scratch_operands = 0 : i64, tpu.core_type = #tpu.core_type<tc>, window_params = [{transform_indices = @transform_0, window_bounds = array<i64: 8, 1>}, {pipeline_mode = #tpu.pipeline_mode<synchronous>, transform_indices = @transform_1, window_bounds = array<i64: 136, 128>}, {transform_indices = @transform_2, window_bounds = array<i64: 8, 128>}]} {
    %c8 = arith.constant 8 : index
    %c0 = arith.constant 0 : index
    %0 = vector.load %arg2[%c8, %c0] : memref<136x128xf32, #tpu.memory_space<vmem>>, vector<128x128xf32>
    %c0_0 = arith.constant 0 : index
    %c0_1 = arith.constant 0 : index
    %1 = vector.load %arg2[%c0_0, %c0_1] : memref<136x128xf32, #tpu.memory_space<vmem>>, vector<1x128xf32>
    %c1 = arith.constant 1 : index
    %c0_2 = arith.constant 0 : index
    %2 = vector.load %arg2[%c1, %c0_2] : memref<136x128xf32, #tpu.memory_space<vmem>>, vector<1x128xf32>
    %c2 = arith.constant 2 : index
    %c0_3 = arith.constant 0 : index
    %3 = vector.load %arg2[%c2, %c0_3] : memref<136x128xf32, #tpu.memory_space<vmem>>, vector<1x128xf32>
    %c3 = arith.constant 3 : index
    %c0_4 = arith.constant 0 : index
    %4 = vector.load %arg2[%c3, %c0_4] : memref<136x128xf32, #tpu.memory_space<vmem>>, vector<1x128xf32>
    %c4 = arith.constant 4 : index
    %c0_5 = arith.constant 0 : index
    %5 = vector.load %arg2[%c4, %c0_5] : memref<136x128xf32, #tpu.memory_space<vmem>>, vector<1x128xf32>
    %c0_6 = arith.constant 0 : index
    %c0_7 = arith.constant 0 : index
    %6 = vector.load %arg1[%c0_6, %c0_7] : memref<8x1xf32, #tpu.memory_space<vmem>>, vector<8x1xf32>
    %7 = vector.broadcast %6 : vector<8x1xf32> to vector<8x128xf32>
    %8 = vector.broadcast %1 : vector<1x128xf32> to vector<8x128xf32>
    %9 = arith.mulf %7, %8 : vector<8x128xf32>
    %10 = vector.broadcast %2 : vector<1x128xf32> to vector<8x128xf32>
    %11 = arith.addf %9, %10 : vector<8x128xf32>
    %cst = arith.constant 0.000000e+00 : f32
    %12 = vector.broadcast %cst : f32 to vector<8x128xf32>
    %13 = arith.maximumf %11, %12 : vector<8x128xf32>
    %cst_8 = arith.constant dense<0.000000e+00> : vector<8x128xf32>
    %14 = tpu.matmul %13, %0, %cst_8 {dimension_numbers = #tpu.dot_dimension_numbers<[1], [0], [0], [1], [0, 0, 1, 1], [], []>} : vector<8x128xf32>, vector<128x128xf32>, vector<8x128xf32> -> vector<8x128xf32>
    %15 = vector.broadcast %3 : vector<1x128xf32> to vector<8x128xf32>
    %16 = arith.addf %14, %15 : vector<8x128xf32>
    %cst_9 = arith.constant 0.000000e+00 : f32
    %17 = vector.broadcast %cst_9 : f32 to vector<8x128xf32>
    %18 = arith.maximumf %16, %17 : vector<8x128xf32>
    %cst_10 = arith.constant dense<0.000000e+00> : vector<8x128xf32>
    %19 = tpu.matmul %18, %0, %cst_10 {dimension_numbers = #tpu.dot_dimension_numbers<[1], [0], [0], [1], [0, 0, 1, 1], [], []>} : vector<8x128xf32>, vector<128x128xf32>, vector<8x128xf32> -> vector<8x128xf32>
    %20 = vector.broadcast %4 : vector<1x128xf32> to vector<8x128xf32>
    %21 = arith.addf %19, %20 : vector<8x128xf32>
    %cst_11 = arith.constant 0.000000e+00 : f32
    %22 = vector.broadcast %cst_11 : f32 to vector<8x128xf32>
    %23 = arith.maximumf %21, %22 : vector<8x128xf32>
    %cst_12 = arith.constant dense<0.000000e+00> : vector<8x128xf32>
    %24 = tpu.matmul %23, %0, %cst_12 {dimension_numbers = #tpu.dot_dimension_numbers<[1], [0], [0], [1], [0, 0, 1, 1], [], []>} : vector<8x128xf32>, vector<128x128xf32>, vector<8x128xf32> -> vector<8x128xf32>
    %25 = vector.broadcast %5 : vector<1x128xf32> to vector<8x128xf32>
    %26 = arith.addf %24, %25 : vector<8x128xf32>
    %cst_13 = arith.constant 0.000000e+00 : f32
    %27 = vector.broadcast %cst_13 : f32 to vector<8x128xf32>
    %28 = arith.maximumf %26, %27 : vector<8x128xf32>
    %c0_14 = arith.constant 0 : index
    %c0_15 = arith.constant 0 : index
    %29 = vector.load %arg3[%c0_14, %c0_15] : memref<8x128xf32, #tpu.memory_space<vmem>>, vector<8x128xf32>
    tpu.vector_store %arg3[%c0_14, %c0_15], %28 {strides = array<i32>} : memref<8x128xf32, #tpu.memory_space<vmem>>, vector<8x128xf32>,
    return
  }
  func.func @transform_0(%arg0: i32) -> (i32, i32) {
    %c0_i32 = arith.constant 0 : i32
    %c0_i32_0 = arith.constant 0 : i32
    return %arg0, %c0_i32 : i32, i32
  }
  func.func @transform_1(%arg0: i32) -> (i32, i32) {
    %c0_i32 = arith.constant 0 : i32
    %c0_i32_0 = arith.constant 0 : i32
    %c0_i32_1 = arith.constant 0 : i32
    return %c0_i32, %c0_i32_0 : i32, i32
  }
  func.func @transform_2(%arg0: i32) -> (i32, i32) {
    %c0_i32 = arith.constant 0 : i32
    %c0_i32_0 = arith.constant 0 : i32
    return %arg0, %c0_i32 : i32, i32
  }
}

</mosaic_0001>

<bundles_post_ra>
// kernel: tpu_custom_call.1
= control target key start
LH: loop header
LB: loop body
LE: loop exit
PB: predicated region body
PF: predicated region fallthrough
CT: control target
= control target key end

     0   :  { %7 = vsyncpa [#allocation3], 0  ;;  %s1091_s0 = inlined_call_operand.vmem [shape: f32[16,1], index: 0, kind: input, shape index: {}]   ;;  %s1092_s1 = inlined_call_operand.hbm [shape: f32[136,128], index: 1, kind: input, shape index: {}]   ;;  %s1093_s2 = inlined_call_operand.hbm [shape: f32[16,128], index: 2, kind: output, shape index: {}]  }
   0x1   :  { %8 = vsyncpa [#allocation4], 0 }
   0x2   :  { %10 = vsyncpa [#allocation4 + $0x1], 0  ;;  %s924_s9 = smov 0   ;;  %s926_s10 = smov 0  }
   0x3   :  { %s928_s11 = smov 0   ;;  %s930_s12 = smov 0  }
   0x4 LB: > { %s945_s13 = sadd.s32 4294967295, %s899_s12   ;;  %s503_s14 = sadd.s32 4294967294, %s899_s12   ;;  %s899_s12 = sphi %s930_s12, %s1109_s12   ;;  %s895_s11 = sphi %s928_s11, %s1108_s11   ;;  %s891_s10 = sphi %s926_s10, %s1107_s10   ;;  %s887_s9 = sphi %s924_s9, %s1106_s9  }
   0x5   : > { %s949_s15 = sadd.s32 1, %s899_s12   ;;  %s70_s16 = sadd.s32 1, %s895_s11 }
   0x6   : > { %s67_s17 = ssub.s32 %s899_s12, %s949_s15  ;;  %p80_p0 = scmp.ne.s32.totalorder %s895_s11, %s891_s10 }
   0x7   : > { %p68_p1 = scmp.eq.s32.totalorder %s67_s17, 0  ;;  %p81_p2 = scmp.eq.s32.totalorder %s945_s13, 1 }
   0x8   : > { %p86_p3 = scmp.ne.s32.totalorder %s891_s10, %s887_s9  ;;  %p87_p4 = scmp.eq.s32.totalorder %s503_s14, 1 }
   0x9   : > { %s960_s18 = scalar_select %p68_p1, %s895_s11, %s70_s16  }
   0xa   : > { %p962_p5 = por %p81_p2, %p80_p0  ;;  %p966_p6 = por %p87_p4, %p86_p3 }
   0xb   : > { %p504_p7 = scmp.ge.s32.totalorder %s899_s12, 1  ;;  %p94_p8 = scmp.lt.s32.totalorder %s899_s12, 3 }
   0xc   : > { %s1097_s19 = scalar_select %p962_p5, 1, 0 }
   0xd   : > { %s1098_s20 = scalar_select %p966_p6, 1, 0 }
   0xe   : > { %p1094_p9 = scmp.eq.s32.totalorder %s945_s13, 0  ;;  %p973_p10 = pnand %p504_p7, %p94_p8 }
   0xf   : > { %s901_s22 = smov [#allocation2]   ;;  %s805_s27 = scalar_lea.hbm %s1092_s1, 2176 }
  0x10   : > { %s1099_s21 = scalar_select %p973_p10, 1, 0 }
  0x11   : > { %s106_s23 = sshll.u32 %s901_s22, 4  ;;  %p754_p11 = pneg %p973_p10  ;;  %s107_s23 = int_to_ptr.vmem [resolvable:$true] %s106_s23 }
  0x12   : > { %p806_p13 = scmp.ne.s32.totalorder %s1092_s1, %s805_s27  ;;  %p812_p3 = scmp.lt.u32.totalorder %s805_s27, %s1092_s1 }
  0x13   : > { %p981_p12 = pnand %p1094_p9, %p754_p11 }
  0x15   : > { %p807_p0 = pneg %p981_p12 }
  0x17   : > { %p808_p1 = pnand %p807_p0, %p806_p13 }
  0x19   : > { %p809_p2 = pneg %p808_p1 }
  0x1b   : > { %p814_p4 = pnand %p812_p3, %p809_p2 }
  0x1d   : > { %817 = shalt.err (!%p814_p4)
}
  0x1e   : > { %s818_s4 = scalar_lea.vmem %s107_s23, 2176  ;;  %p826_p9 = scmp.lt.s32.totalorder %s107_s23, %s107_s23 }
  0x1f   : > { %p819_p7 = scmp.ne.s32.totalorder %s107_s23, %s818_s4  ;;  %p827_p6 = scmp.lt.s32.totalorder %s818_s4, %s818_s4 }
  0x21   : > { %p821_p8 = pnand %p819_p7, %p807_p0  ;;  %p828_p5 = por %p827_p6, %p826_p9 }
  0x23   : > { %p822_p11 = pneg %p821_p8 }
  0x25   : > { %p829_p10 = pnand %p828_p5, %p822_p11 }
  0x27   : > { %832 = shalt.err (!%p829_p10)
}
  0x28   : > { %s902_s5 = smov 128   ;;  %s903_s6 = smov 8  }
  0x29   : > { %757 = dma.hbm_to_vmem [thread:$0]  (!%p981_p12), %s1092_s1, 2176, %s107_s23, [#allocation3], %s902_s5, %s902_s5, %s903_s6  }
  0x2a   : > { %p1101_p13 = scmp.ne.s32.totalorder %s1099_s21, 0 }
  0x2b   : > { %p1102_p1 = scmp.eq.s32.totalorder (!%p1101_p13), %s945_s13, 0 }
  0x2c   : > { %129 = sbr.rel (%p1101_p13) target bundleno = 855 (0x357), region = 28 }
  0x33   : > { %878 = dma.done.wait (%p1102_p1), [#allocation3], 2176   ;;  %p1103_p0 = pmov %p1102_p1 }
  0x34   : > { %p150_p5 = scmp.lt.s32.totalorder %s945_s13, 1  ;;  %v904_v0 = vmov 0   ;;  %v905_v1 = vmov 0.0|0.0   ;;  %v154_v3 = vld [vmem:[#allocation2 + $0x8] sm:$0xff]  ;;  %v155_v4 = vld [vmem:[#allocation2 + $0x10] sm:$0xff]  ;;  %v156_v6 = vld [vmem:[#allocation2 + $0x18] sm:$0xff] }
  0x35   : > { %880 = vsyncadd (%p1103_p0), [#allocation3], 4294965120  ;;  %804 = vset.pattern.permute.xlu0 %v904_v0  ;;  %676 = vmatprep.subr.bf16.mxu0 %v905_v1  ;;  %v1014_v5 = vpack.c.bf16 %v155_v4, %v154_v3  ;;  %v157_v7 = vld [vmem:[#allocation2 + $0x20] sm:$0xff]  ;;  %v158_v9 = vld [vmem:[#allocation2 + $0x28] sm:$0xff]  ;;  %vm906_vm0 = vmmov 0   ;;  %v907_v11 = vmov 0.0  }
  0x36   : > { %s151_s14 = scalar_select %p150_p5, %s945_s13, 1  ;;  %700 = vmatprep.subr.bf16.mxu1 %v905_v1  ;;  %v680_v8 = vpack.c.bf16 %v157_v7, %v156_v6  ;;  %v159_v10 = vld [vmem:[#allocation2 + $0x30] sm:$0xff]  ;;  %603 = vmatprep.mubr.msk.f32.mxu0 %vm906_vm0, %v907_v11  ;;  %v160_v13 = vld [vmem:[#allocation2 + $0x38] sm:$0xff]  ;;  %v161_v14 = vld [vmem:[#allocation2 + $0x40] sm:$0xff] }
  0x37   : > { %678 = vmatpush3.bf16.msra.mxu0 %v1014_v5  ;;  %702 = vmatpush3.bf16.msra.mxu1 %v1014_v5  ;;  %v683_v12 = vpack.c.bf16 %v159_v10, %v158_v9  ;;  %v686_v15 = vpack.c.bf16 %v161_v14, %v160_v13  ;;  %v162_v16 = vld [vmem:[#allocation2 + $0x48] sm:$0xff]  ;;  %v163_v17 = vld [vmem:[#allocation2 + $0x50] sm:$0xff]  ;;  %v164_v19 = vld [vmem:[#allocation2 + $0x58] sm:$0xff]  ;;  %s147_s23 = sand.u32 1, %s891_s10   ;;  %s517_s25 = sshll.u32 %s945_s13, 7 }
  0x38   : > { %s510_s16 = sshll.u32 %s151_s14, 3  ;;  %679 = vmatprep.subr.bf16.mxu0 %v905_v1  ;;  %703 = vmatprep.subr.bf16.mxu1 %v905_v1  ;;  %v689_v18 = vpack.c.bf16 %v163_v17, %v162_v16  ;;  %v165_v20 = vld [vmem:[#allocation2 + $0x60] sm:$0xff]  ;;  %v166_v22 = vld [vmem:[#allocation2 + $0x68] sm:$0xff]  ;;  %v167_v23 = vld [vmem:[#allocation2 + $0x70] sm:$0xff]  ;;  %s509_s24 = sshll.u32 %s147_s23, 3 }
  0x39   : > { %s153_s22 = scalar_lea.vmem %s1091_s0, %s510_s16  ;;  %638 = vmatprep.mubr.msk.f32.mxu1 %vm906_vm0, %v907_v11  ;;  %v692_v21 = vpack.c.bf16 %v165_v20, %v164_v19  ;;  %v695_v24 = vpack.c.bf16 %v167_v23, %v166_v22  ;;  %v168_v25 = vld [vmem:[#allocation2 + $0x78] sm:$0xff]  ;;  %v169_v26 = vld [vmem:[#allocation2 + $0x80] sm:$0xff]  ;;  %s149_s26 = scalar_lea.vmem [#allocation5], %s509_s24 }
  0x3a   : > { %v175_v2 = vld [vmem:[%s153_s22] sm:$0xff]  ;;  %v698_v27 = vpack.c.bf16 %v169_v26, %v168_v25  ;;  %s432_s27 = sshll.u32 %s149_s26, 4  ;;  %s1049_s30 = scalar_lea.hbm %s1093_s2, %s517_s25  ;;  %s1051_s27 = int_to_ptr.vmem [resolvable:$true] %s432_s27 }
  0x3b   : > { %178 = vperm.xlu0 %804, %v175_v2   ;;  %681 = vmatpush3.bf16.msra.mxu0 %v680_v8  ;;  %v511_v28 = vld [vmem:[#allocation2] ss:$0 sm:$0xff]  ;;  %v512_v30 = vld [vmem:[#allocation2 + $0x1] ss:$0 sm:$0xff]  ;;  %v513_v34 = vld [vmem:[#allocation2 + $0x2] ss:$0 sm:$0xff] }
  0x3c   : > { %705 = vmatpush3.bf16.msra.mxu1 %v680_v8  ;;  %682 = vmatprep.subr.bf16.mxu0 %v905_v1  ;;  %v514_v39 = vld [vmem:[#allocation2 + $0x3] ss:$0 sm:$0xff]  ;;  %v515_v44 = vld [vmem:[#allocation2 + $0x4] ss:$0 sm:$0xff]  ;;  %s419_s3 = scalar_lea.sflag [#allocation4], %s147_s23  ;;  %s833_s4 = scalar_lea.vmem %s1051_s27, 128 }
  0x3d   : > { %706 = vmatprep.subr.bf16.mxu1 %v905_v1  ;;  %p834_p6 = scmp.ne.s32.totalorder %s1051_s27, %s833_s4  ;;  %p1104_p9 = scmp.ne.s32.totalorder %s1097_s19, 0 }
  0x3e   : > { %s908_s13 = smov [#allocation5]  }
  0x3f   : > { %684 = vmatpush3.bf16.msra.mxu0 %v683_v12  ;;  %p835_p10 = pnand %p834_p6, %p1104_p9  ;;  %s837_s5 = sshll.u32 %s908_s13, 4  ;;  %s838_s5 = int_to_ptr.vmem [resolvable:$false] %s837_s5 }
  0x40   : > { %708 = vmatpush3.bf16.msra.mxu1 %v683_v12  ;;  %685 = vmatprep.subr.bf16.mxu0 %v905_v1  ;;  %s839_s6 = scalar_lea.vmem %s838_s5, 256  ;;  %p840_p2 = scmp.lt.s32.totalorder %s1051_s27, %s838_s5 }
  0x41   : > { %709 = vmatprep.subr.bf16.mxu1 %v905_v1  ;;  %p836_p12 = pneg %p835_p10  ;;  %p841_p3 = scmp.lt.s32.totalorder %s839_s6, %s833_s4 }
  0x43   : > { %687 = vmatpush3.bf16.msra.mxu0 %v686_v15  ;;  %p842_p4 = por %p841_p3, %p840_p2 }
  0x44   : > { %711 = vmatpush3.bf16.msra.mxu1 %v686_v15  ;;  %688 = vmatprep.subr.bf16.mxu0 %v905_v1 }
  0x45   : > { %712 = vmatprep.subr.bf16.mxu1 %v905_v1  ;;  %p843_p7 = pnand %p842_p4, %p836_p12 }
  0x47   : > { %690 = vmatpush3.bf16.msra.mxu0 %v689_v18 }
  0x48   : > { %714 = vmatpush3.bf16.msra.mxu1 %v689_v18  ;;  %691 = vmatprep.subr.bf16.mxu0 %v905_v1 }
  0x49   : > { %715 = vmatprep.subr.bf16.mxu1 %v905_v1 }
  0x4b   : > { %693 = vmatpush3.bf16.msra.mxu0 %v692_v21 }
  0x4c   : > { %717 = vmatpush3.bf16.msra.mxu1 %v692_v21  ;;  %694 = vmatprep.subr.bf16.mxu0 %v905_v1 }
  0x4d   : > { %718 = vmatprep.subr.bf16.mxu1 %v905_v1 }
  0x4f   : > { %696 = vmatpush3.bf16.msra.mxu0 %v695_v24 }
  0x50   : > { %720 = vmatpush3.bf16.msra.mxu1 %v695_v24  ;;  %697 = vmatprep.subr.bf16.mxu0 %v905_v1 }
  0x51   : > { %721 = vmatprep.subr.bf16.mxu1 %v905_v1 }
  0x53   : > { %699 = vmatpush3.bf16.msra.mxu0 %v698_v27 }
  0x54   : > { %723 = vmatpush3.bf16.msra.mxu1 %v698_v27  ;;  %724 = vmatprep.subr.bf16.mxu0 %v905_v1 }
  0xba   : > { %v179_v29 = vpop.permute.xlu0 %178 }
  0xbb   : > { %v185_v31 = vmul.f32 %v511_v28, %v179_v29 }
  0xbd   : > { %v190_v32 = vadd.f32 %v512_v30, %v185_v31 }
  0xbf   : > { %v191_v33 = vmax.f32 %v190_v32, 0.0 }
  0xc1   : > { %604 = vmatmul.mubr.f32.vlgmr.msra.gmra.mrb[0].mxu0 %v191_v33 }
  0xc2   : > { %726 = vmatpush3.bf16.msra.mxu0 %v1014_v5  ;;  %673 = vmatprep.mubr.msk.f32.mxu0 %vm906_vm0, %v907_v11 }
  0xc3   : > { %727 = vmatprep.subr.bf16.mxu0 %v905_v1 }
  0xc6   : > { %729 = vmatpush3.bf16.msra.mxu0 %v680_v8 }
  0xc7   : > { %730 = vmatprep.subr.bf16.mxu0 %v905_v1 }
  0xca   : > { %732 = vmatpush3.bf16.msra.mxu0 %v683_v12 }
  0xcb   : > { %733 = vmatprep.subr.bf16.mxu0 %v905_v1 }
  0xce   : > { %735 = vmatpush3.bf16.msra.mxu0 %v686_v15 }
  0xcf   : > { %736 = vmatprep.subr.bf16.mxu0 %v905_v1 }
  0xd2   : > { %738 = vmatpush3.bf16.msra.mxu0 %v689_v18 }
  0xd3   : > { %739 = vmatprep.subr.bf16.mxu0 %v905_v1 }
  0xd6   : > { %741 = vmatpush3.bf16.msra.mxu0 %v692_v21 }
  0xd7   : > { %742 = vmatprep.subr.bf16.mxu0 %v905_v1 }
  0xda   : > { %744 = vmatpush3.bf16.msra.mxu0 %v695_v24 }
  0xdb   : > { %745 = vmatprep.subr.bf16.mxu0 %v905_v1 }
  0xde   : > { %747 = vmatpush3.bf16.msra.mxu0 %v698_v27 }
 0x194   : > { %v262_v35 = vpop.f32.mrb[0].mxu0 }
 0x195   : > { %v263_v36 = vadd.f32 %v513_v34, %v262_v35  ;;  %v605_v37 = vpop.f32.mrb[1].mxu0 }
 0x197   : > { %v266_v38 = vmax.f32 %v263_v36, 0.0 }
 0x199   : > { %639 = vmatmul.mubr.f32.vlgmr.msra.gmra.mrb[0].mxu1 %v266_v38 }
 0x26c   : > { %v337_v40 = vpop.f32.mrb[0].mxu1 }
 0x26d   : > { %v338_v41 = vadd.f32 %v514_v39, %v337_v40  ;;  %v640_v42 = vpop.f32.mrb[1].mxu1 }
 0x26f   : > { %v341_v43 = vmax.f32 %v338_v41, 0.0 }
 0x271   : > { %674 = vmatmul.mubr.f32.vlgmr.msra.gmra.mrb[2].mxu0 %v341_v43 }
 0x344   : > { %v412_v45 = vpop.f32.mrb[2].mxu0 }
 0x345   : > { %v413_v46 = vadd.f32 %v515_v44, %v412_v45  ;;  %v675_v47 = vpop.f32.mrb[3].mxu0 }
 0x347   : > { %v416_v48 = vmax.f32 %v413_v46, 0.0 }
 0x349   : > { %417 = vst [vmem:[%s149_s26] sm:$0xff] %v416_v48 }
 0x34a   : > { %846 = shalt.err (!%p843_p7)
}
 0x34b   : > { %s847_s7 = scalar_lea.hbm %s1049_s30, 128  ;;  %s851_s16 = scalar_lea.hbm %s1093_s2, 256 }
 0x34c   : > { %p848_p8 = scmp.ne.s32.totalorder %s1049_s30, %s847_s7  ;;  %p852_p1 = scmp.lt.u32.totalorder %s1049_s30, %s1093_s2 }
 0x34d   : > { %p853_p0 = scmp.lt.u32.totalorder %s851_s16, %s847_s7  ;;  %p855_p6 = scmp.lt.u32.totalorder %s847_s7, %s1049_s30 }
 0x34e   : > { %p849_p11 = pnand %p848_p8, %p1104_p9 }
 0x34f   : > { %p854_p5 = por %p853_p0, %p852_p1 }
 0x350   : > { %p850_p13 = pneg %p849_p11 }
 0x351   : > { %p856_p10 = por %p855_p6, %p854_p5 }
 0x353   : > { %p857_p12 = pnand %p856_p10, %p850_p13 }
 0x355   : > { %860 = shalt.err (!%p857_p12)
}
 0x356   : > { %752 = dma.vmem_to_hbm [thread:$0]  (%p1104_p9), %s1051_s27, 128, %s1049_s30, %s419_s3  }
 0x357 PF: > { %p764_p2 = scmp.ge.s32.totalorder %s899_s12, 2  ;;  %s444_s22 = sand.u32 1, %s887_s9  }
 0x358   : > { %p1105_p3 = scmp.ne.s32.totalorder %s1098_s20, 0  ;;  %s445_s23 = scalar_lea.sflag [#allocation4], %s444_s22 }
 0x35a   : > { %p759_p4 = pnand %p764_p2, %p1105_p3 }
 0x35c   : > { %882 = dma.done.wait (!%p759_p4), %s445_s23, 128  }
 0x35d   : > { %884 = vsyncadd (!%p759_p4), %s445_s23, 4294967168  ;;  %p13_p7 = scmp.ge.s32.totalorder %s949_s15, 4   ;;  %s1106_s9 = smov %s891_s10 }
 0x35e   : > { %s1107_s10 = smov %s895_s11  ;;  %s1108_s11 = smov %s960_s18 }
 0x35f   : > { %s1109_s12 = smov %s949_s15  ;;  %15 = sbr.rel (!%p13_p7) target bundleno = 4 (0x4), region = 68 }
 0x366   :  { %450 = vsyncpa [#allocation3], 1 }
 0x367   :  { %452 = vsyncpa [#allocation3 + $0x1], 1 }
 0x368   :  { %453 = vsyncpa [#allocation4], 1 }
 0x369   :  { %455 = vsyncpa [#allocation4 + $0x1], 1 }

</bundles_post_ra>
